<compile_context>
chip_gen: v7x
topology: tpu7x:2x2x1
jax: 0.10.0
libtpu: 0.0.40
codegen_flags: <defaults>
</compile_context>

<pallas_src>
import functools

import jax
import jax.numpy as jnp
from jax.experimental import pallas as pl
from jax.experimental.pallas import tpu as pltpu

_LANE = 128


def _round_up(v, m):
    return ((v + m - 1) // m) * m


def _pick_tile_rows(ho, wo, requested):
    """How many output rows each spatial tile covers (divides ho, lane/sublane friendly)."""
    if requested is not None:
        if ho % requested != 0:
            raise ValueError("tile_h must divide the output height")
        if requested != ho and (requested * wo) % 8 != 0:
            raise ValueError("tile_h * Wo must be a multiple of 8")
        return requested
    target = max(1, 2048 // max(wo, 1))            # ~2048 output pixels per tile
    cand = [d for d in range(1, ho + 1)
            if ho % d == 0 and d <= target and (d * wo) % 8 == 0]
    return max(cand) if cand else ho


def _conv_bn_silu_tile(x, wc_ref, bnb_ref, *, k, s, th, wo):
    """k x k conv (eval BN folded into weight/bias) + SiLU on one spatial row-tile.

    Builds an im2col patch (th*wo, k*k*c1) in VMEM from the halo'd row window `x`
    (shape (th_in, Wp, c1)) and issues one MXU matmul against the (k*k*c1, c2p) weight.
    """
    cols = []
    for ky in range(k):
        for kx in range(k):
            if s == 1:
                win = x[ky:ky + th, kx:kx + wo, :]
            else:
                # TODO(synk): stride > 1 uses strided value slices; not exercised by the tests.
                win = x[ky:ky + (th - 1) * s + 1:s, kx:kx + (wo - 1) * s + 1:s, :]
            cols.append(win.reshape(th * wo, -1))
    patch = cols[0] if len(cols) == 1 else jnp.concatenate(cols, axis=-1)
    acc = jnp.dot(patch, wc_ref[...], preferred_element_type=jnp.float32)
    return jax.nn.silu(acc + bnb_ref[...])


# --------------------------------------------------------------------------- #
# Pass A: conv + BN + SiLU per tile, accumulate the global spatial sum (SE pool).
# Grid (B, n_split, n_tt): n_split partial sums let both v7x TensorCores work at B=1.
# --------------------------------------------------------------------------- #
def _pool_pass_kernel(x_ref, wc_ref, bnb_ref, psum_ref, *, k, s, th, th_in, wo, n_tt):
    c = pl.program_id(1)
    tt = pl.program_id(2)

    @pl.when(tt == 0)
    def _():
        psum_ref[...] = jnp.zeros_like(psum_ref)

    t = c * n_tt + tt
    x = x_ref[pl.ds(t * th * s, th_in)]                    # halo'd row window from resident image
    y = _conv_bn_silu_tile(x, wc_ref, bnb_ref, k=k, s=s, th=th, wo=wo)
    psum_ref[...] += jnp.sum(y, axis=0, keepdims=True)     # (1, c2p) f32


# --------------------------------------------------------------------------- #
# Pass B: recompute conv tile, add precomputed SE gate, final 1x1 conv.
# --------------------------------------------------------------------------- #
def _main_pass_kernel(x_ref, gate_ref, wc_ref, bnb_ref, w3_ref, b3_ref, out_ref,
                      *, k, s, th, th_in, wo):
    t = pl.program_id(1)
    x = x_ref[pl.ds(t * th * s, th_in)]
    y = _conv_bn_silu_tile(x, wc_ref, bnb_ref, k=k, s=s, th=th, wo=wo)
    y = y + gate_ref[...]                                  # additive SE gate (per batch, f32)
    out = jnp.dot(y.astype(w3_ref.dtype), w3_ref[...],
                  preferred_element_type=jnp.float32) + b3_ref[...]
    out_ref[...] = out.astype(out_ref.dtype)


# --------------------------------------------------------------------------- #
# Weight preparation: BN folding, im2col weight layout, lane padding.
# Call once for inference and reuse the result across forwards.
# --------------------------------------------------------------------------- #
def prepare_params(params, *, k, compute_dtype=jnp.bfloat16):
    c2, c1 = params["conv_w"].shape[:2]
    c3 = params["se_w1"].shape[0]
    c2p = _round_up(c2, _LANE)

    scale = params["bn_gamma"] / jnp.sqrt(params["bn_var"] + params["bn_eps"])   # (c2,)
    bnb = params["bn_beta"] - params["bn_mean"] * scale                          # (c2,)
    wconv = params["conv_w"] * scale[:, None, None, None]                        # (c2,c1,k,k)
    wconv = jnp.transpose(wconv, (2, 3, 1, 0)).reshape(k * k * c1, c2)           # im2col layout

    return dict(
        c1=c1, c2=c2, c3=c3, c2p=c2p,
        wconv=jnp.pad(wconv, ((0, 0), (0, c2p - c2))).astype(compute_dtype),
        bnb=jnp.pad(bnb, (0, c2p - c2)).reshape(1, c2p).astype(jnp.float32),
        # SE weights stay small / unpadded / f32: the gate is computed once per batch in XLA.
        se_w1=params["se_w1"].reshape(c3, c2).astype(jnp.float32),
        se_b1=params["se_b1"].astype(jnp.float32),
        se_w2=params["se_w2"].reshape(c2, c3).astype(jnp.float32),
        se_b2=params["se_b2"].astype(jnp.float32),
        w3=jnp.pad(params["proj_w"].reshape(c2, c2).T,
                   ((0, c2p - c2), (0, c2p - c2))).astype(compute_dtype),
        b3=jnp.pad(params["proj_b"], (0, c2p - c2)).reshape(1, c2p).astype(jnp.float32),
    )


# --------------------------------------------------------------------------- #
# Wrapper: layout glue (NCHW<->NHWC), two-pass SE, VMEM budgeting.
# --------------------------------------------------------------------------- #
def inverted_residual_conv_pallas(x_nchw, params, *, k, s, tile_h=None,
                                  compute_dtype=jnp.bfloat16):
    """Forward pass of InvertedResidualConv (eval-mode BN) via Pallas TPU kernels.

    `params` may be raw PyTorch-layout tensors (conv_w, bn_*, se_*, proj_*) or the
    result of prepare_params() (preferred for inference: fold/pad once, reuse).
    """
    if "wconv" not in params:                      # raw params -> fold/pad on the fly
        params = prepare_params(params, k=k, compute_dtype=compute_dtype)
    pp = params
    compute_dtype = pp["wconv"].dtype
    itemsize = jnp.dtype(compute_dtype).itemsize

    B, c1, H, W = x_nchw.shape
    c2, c2p = pp["c2"], pp["c2p"]
    assert c1 == pp["c1"], "channel mismatch between x and params"
    residual = (c1 == c2) and (s == 1)

    p = k // 2
    Hp, Wp = H + 2 * p, W + 2 * p
    Ho = (H + 2 * p - k) // s + 1
    Wo = (W + 2 * p - k) // s + 1
    N = Ho * Wo

    th = _pick_tile_rows(Ho, Wo, tile_h)
    n_th = Ho // th
    th_in = (th - 1) * s + k
    n_split = 2 if (n_th >= 2 and n_th % 2 == 0) else 1   # v7x: 2 partial SE sums
    n_tt = n_th // n_split

    # Padded NHWC input, resident per batch in VMEM (no halo-duplicated HBM copy).
    # TODO(synk): feature maps whose padded image approaches the VMEM budget would need a
    # manual-DMA halo'd row-tile path (memory_space=pl.ANY + make_async_copy) instead.
    x_nhwc = jnp.transpose(x_nchw, (0, 2, 3, 1))                            # (B,H,W,c1) f32
    xpad = jnp.pad(x_nhwc, ((0, 0), (p, p), (p, p), (0, 0))).astype(compute_dtype)

    # ---- VMEM budget derived from actual buffer sizes, capped per generation ----
    x_blk = Hp * Wp * c1 * itemsize
    out_blk = th * Wo * c2p * itemsize
    w_blk = (k * k * c1 * c2p + c2p * c2p) * itemsize + 3 * c2p * 4
    tmp = th * Wo * (k * k * c1 + 3 * c2p) * 4            # patch / acc / y temporaries (f32)
    vmem_est = 2 * (x_blk + out_blk) + 2 * w_blk + tmp + (4 << 20)
    try:
        vmem_cap = int(pltpu.get_tpu_info().vmem_capacity_bytes)
    except Exception:                                       # noqa: BLE001
        vmem_cap = 0
    if vmem_cap < (48 << 20):
        vmem_cap = 64 << 20                                 # conservative (v7x per-TC)
    vmem_limit = int(min(max(vmem_est, 32 << 20), int(0.75 * vmem_cap)))

    xpad_bytes = int(xpad.size * itemsize)
    wA_bytes = int(pp["wconv"].size * itemsize + pp["bnb"].size * 4)

    # -------------------- pass A: global SE pool -------------------- #
    pool_kernel = functools.partial(_pool_pass_kernel, k=k, s=s, th=th,
                                    th_in=th_in, wo=Wo, n_tt=n_tt)
    psum = pl.pallas_call(
        pool_kernel,
        out_shape=jax.ShapeDtypeStruct((B, n_split, 1, c2p), jnp.float32),
        grid_spec=pltpu.PrefetchScalarGridSpec(
            num_scalar_prefetch=0,
            grid=(B, n_split, n_tt),
            in_specs=[
                pl.BlockSpec((None, Hp, Wp, c1), lambda b, c, t: (b, 0, 0, 0)),
                pl.BlockSpec((k * k * c1, c2p), lambda b, c, t: (0, 0)),
                pl.BlockSpec((1, c2p), lambda b, c, t: (0, 0)),
            ],
            out_specs=pl.BlockSpec((None, None, 1, c2p), lambda b, c, t: (b, c, 0, 0)),
        ),
        compiler_params=pltpu.CompilerParams(
            dimension_semantics=("parallel", "parallel", "arbitrary"),
            vmem_limit_bytes=vmem_limit),
        cost_estimate=pl.CostEstimate(
            flops=int(2 * B * N * (k * k * c1) * c2p),
            transcendentals=int(B * N * c2p),
            bytes_accessed=int(xpad_bytes + wA_bytes + B * n_split * c2p * 4)),
    )(xpad, pp["wconv"], pp["bnb"])

    # ---- SE gate: computed ONCE per batch in plain JAX (f32), padded to c2p lanes ----
    pooled = psum.sum(axis=1)[:, 0, :c2] * (1.0 / float(N))                 # (B, c2)
    z = jax.nn.silu(pooled @ pp["se_w1"].T + pp["se_b1"])                   # (B, c3)
    g = jax.nn.sigmoid(z @ pp["se_w2"].T + pp["se_b2"])                     # (B, c2)
    gate = jnp.pad(g, ((0, 0), (0, c2p - c2))).reshape(B, 1, c2p).astype(jnp.float32)

    # -------------------- pass B: conv tile + gate + 1x1 conv -------------------- #
    main_kernel = functools.partial(_main_pass_kernel, k=k, s=s, th=th,
                                    th_in=th_in, wo=Wo)
    wB_bytes = wA_bytes + int(pp["w3"].size * itemsize + pp["b3"].size * 4)
    out_bytes = int(B * N * c2p * itemsize)
    out_p = pl.pallas_call(
        main_kernel,
        out_shape=jax.ShapeDtypeStruct((B, N, c2p), compute_dtype),
        grid_spec=pltpu.PrefetchScalarGridSpec(
            num_scalar_prefetch=0,
            grid=(B, n_th),
            in_specs=[
                pl.BlockSpec((None, Hp, Wp, c1), lambda b, t: (b, 0, 0, 0)),
                pl.BlockSpec((None, 1, c2p), lambda b, t: (b, 0, 0)),
                pl.BlockSpec((k * k * c1, c2p), lambda b, t: (0, 0)),
                pl.BlockSpec((1, c2p), lambda b, t: (0, 0)),
                pl.BlockSpec((c2p, c2p), lambda b, t: (0, 0)),
                pl.BlockSpec((1, c2p), lambda b, t: (0, 0)),
            ],
            out_specs=pl.BlockSpec((None, th * Wo, c2p), lambda b, t: (b, t, 0)),
        ),
        compiler_params=pltpu.CompilerParams(
            dimension_semantics=("parallel", "parallel"),
            vmem_limit_bytes=vmem_limit),
        cost_estimate=pl.CostEstimate(
            flops=int(2 * B * N * (k * k * c1 + c2p) * c2p),
            transcendentals=int(B * N * c2p),
            bytes_accessed=int(xpad_bytes + wB_bytes + B * c2p * 4 + out_bytes)),
    )(xpad, gate, pp["wconv"], pp["bnb"], pp["w3"], pp["b3"])

    # ---- epilogue: slice lane padding (free reshape), add unpadded residual, to NCHW ----
    out = out_p[:, :, :c2].astype(jnp.float32).reshape(B, Ho, Wo, c2)
    if residual:
        out = out + x_nhwc
    return jnp.transpose(out, (0, 3, 1, 2)).astype(x_nchw.dtype)            # NCHW


# --------------------------------------------------------------------------- #
# Pure-JAX reference (NCHW, PyTorch semantics) for verification.
# --------------------------------------------------------------------------- #
def _ref_forward(x, params, *, k, s):
    c1 = x.shape[1]
    c2 = params["conv_w"].shape[0]
    c3 = params["se_w1"].shape[0]
    residual = (c1 == c2) and (s == 1)
    p = k // 2
    y = jax.lax.conv_general_dilated(
        x, params["conv_w"], (s, s), ((p, p), (p, p)),
        dimension_numbers=("NCHW", "OIHW", "NCHW"))
    inv = params["bn_gamma"] / jnp.sqrt(params["bn_var"] + params["bn_eps"])
    y = (y - params["bn_mean"][None, :, None, None]) * inv[None, :, None, None] \
        + params["bn_beta"][None, :, None, None]
    y = jax.nn.silu(y)
    pooled = jnp.mean(y, axis=(2, 3), keepdims=True)
    z = jnp.einsum("oc,bcxy->boxy", params["se_w1"].reshape(c3, c2), pooled) \
        + params["se_b1"][None, :, None, None]
    z = jax.nn.silu(z)
    g = jax.nn.sigmoid(
        jnp.einsum("oc,bcxy->boxy", params["se_w2"].reshape(c2, c3), z)
        + params["se_b2"][None, :, None, None])
    y = y + g
    out = jnp.einsum("oc,bcxy->boxy", params["proj_w"].reshape(c2, c2), y) \
        + params["proj_b"][None, :, None, None]
    if residual:
        out = out + x
    return out


def _make_params(key, c1, c2, c3, k):
    ks = jax.random.split(key, 11)
    return dict(
        conv_w=0.2 * jax.random.normal(ks[0], (c2, c1, k, k), jnp.float32),
        bn_gamma=1.0 + 0.1 * jax.random.normal(ks[1], (c2,), jnp.float32),
        bn_beta=0.1 * jax.random.normal(ks[2], (c2,), jnp.float32),
        bn_mean=0.1 * jax.random.normal(ks[3], (c2,), jnp.float32),
        bn_var=0.5 + jax.nn.softplus(jax.random.normal(ks[4], (c2,), jnp.float32)),
        bn_eps=1e-5,
        se_w1=0.2 * jax.random.normal(ks[5], (c3, c2, 1, 1), jnp.float32),
        se_b1=0.1 * jax.random.normal(ks[6], (c3,), jnp.float32),
        se_w2=0.2 * jax.random.normal(ks[7], (c2, c3, 1, 1), jnp.float32),
        se_b2=0.1 * jax.random.normal(ks[8], (c2,), jnp.float32),
        proj_w=0.2 * jax.random.normal(ks[9], (c2, c2, 1, 1), jnp.float32),
        proj_b=0.1 * jax.random.normal(ks[10], (c2,), jnp.float32),
    )


if __name__ == "__main__":
    key = jax.random.PRNGKey(0)
    k0, k1, k2, k3 = jax.random.split(key, 4)

    # Case 1: residual path (c1 == c2, s == 1), f32 compute, tile_h=4 so the cross-tile
    # SE-pool accumulation and the 2-way pass-A split are both exercised.
    B, c1, c2, c3, kk, s, H, W = 2, 4, 4, 8, 3, 1, 16, 16
    x = jax.random.normal(k0, (B, c1, H, W), jnp.float32)
    params = _make_params(k1, c1, c2, c3, kk)
    out = jax.block_until_ready(
        inverted_residual_conv_pallas(x, params, k=kk, s=s, tile_h=4,
                                      compute_dtype=jnp.float32))
    ref = _ref_forward(x, params, k=kk, s=s)
    if not jnp.allclose(out, ref, atol=2e-3, rtol=2e-3):
        raise AssertionError("case 1 (residual, f32) mismatch, max err = %g"
                             % float(jnp.max(jnp.abs(out - ref))))

    # Case 2: non-residual path (c1 != c2), default bf16 compute, single spatial tile,
    # pre-folded weights (prepare_params) reused by the call.
    B, c1, c2, c3, kk, s, H, W = 2, 4, 6, 8, 3, 1, 16, 16
    x = jax.random.normal(k2, (B, c1, H, W), jnp.float32)
    params = _make_params(k3, c1, c2, c3, kk)
    prepared = prepare_params(params, k=kk)          # bf16 weights, folded once
    out = jax.block_until_ready(
        inverted_residual_conv_pallas(x, prepared, k=kk, s=s))
    ref = _ref_forward(x, params, k=kk, s=s)
    if not jnp.allclose(out, ref, atol=8e-2, rtol=8e-2):
        raise AssertionError("case 2 (no residual, bf16) mismatch, max err = %g"
                             % float(jnp.max(jnp.abs(out - ref))))

    print("KERNEL_OK")
</pallas_src>

<mosaic_0001>
module attributes {stable_mosaic.version = 11 : i64} {
  func.func @_pool_pass_kernel(%arg0: i32, %arg1: i32, %arg2: i32, %arg3: memref<1x18x18x4xf32, #tpu.memory_space<vmem>>, %arg4: memref<36x128xf32, #tpu.memory_space<vmem>>, %arg5: memref<1x128xf32, #tpu.memory_space<vmem>>, %arg6: memref<1x1x1x128xf32, #tpu.memory_space<vmem>>) attributes {dimension_semantics = [#tpu.dimension_semantics<parallel>, #tpu.dimension_semantics<parallel>, #tpu.dimension_semantics<arbitrary>], iteration_bounds = array<i64: 2, 2, 2>, scalar_prefetch = 0 : i64, scratch_operands = 0 : i64, tpu.core_type = #tpu.core_type<tc>, window_params = [{transform_indices = @transform_0, window_bounds = array<i64: 1, 18, 18, 4>}, {pipeline_mode = #tpu.pipeline_mode<synchronous>, transform_indices = @transform_1, window_bounds = array<i64: 36, 128>}, {pipeline_mode = #tpu.pipeline_mode<synchronous>, transform_indices = @transform_2, window_bounds = array<i64: 1, 128>}, {transform_indices = @transform_3, window_bounds = array<i64: 1, 1, 1, 128>}]} {
    %c0_i32 = arith.constant 0 : i32
    %0 = arith.cmpi eq, %arg2, %c0_i32 : i32
    %1 = arith.extui %0 : i1 to i32
    %c0_i32_0 = arith.constant 0 : i32
    %2 = arith.cmpi ne, %1, %c0_i32_0 : i32
    scf.if %2 {
      %cst_17 = arith.constant 0.000000e+00 : f32
      %48 = vector.broadcast %cst_17 : f32 to vector<1x128xf32>
      %c0_18 = arith.constant 0 : index
      %c0_19 = arith.constant 0 : index
      %c0_20 = arith.constant 0 : index
      %c0_21 = arith.constant 0 : index
      %49 = vector.load %arg6[%c0_18, %c0_19, %c0_20, %c0_21] : memref<1x1x1x128xf32, #tpu.memory_space<vmem>>, vector<1x1x1x128xf32>
      %50 = vector.shape_cast %49 : vector<1x1x1x128xf32> to vector<1x128xf32>
      %51 = vector.shape_cast %48 : vector<1x128xf32> to vector<1x1x1x128xf32>
      tpu.vector_store %arg6[%c0_18, %c0_19, %c0_20, %c0_21], %51 {strides = array<i32>} : memref<1x1x1x128xf32, #tpu.memory_space<vmem>>, vector<1x1x1x128xf32>,
    } else {
    }
    %c2_i32 = arith.constant 2 : i32
    %3 = arith.muli %arg1, %c2_i32 : i32
    %4 = arith.addi %3, %arg2 : i32
    %c4_i32 = arith.constant 4 : i32
    %5 = arith.muli %4, %c4_i32 : i32
    %c1_i32 = arith.constant 1 : i32
    %6 = arith.muli %5, %c1_i32 : i32
    %c0 = arith.constant 0 : index
    %7 = arith.index_cast %6 : i32 to index
    %c0_1 = arith.constant 0 : index
    %c0_2 = arith.constant 0 : index
    %8 = vector.load %arg3[%c0, %7, %c0_1, %c0_2] : memref<1x18x18x4xf32, #tpu.memory_space<vmem>>, vector<1x6x18x4xf32>
    %9 = vector.shape_cast %8 : vector<1x6x18x4xf32> to vector<6x18x4xf32>
    %10 = vector.extract_strided_slice %9 {offsets = [0, 0, 0], sizes = [4, 16, 4], strides = [1, 1, 1]} : vector<6x18x4xf32> to vector<4x16x4xf32>
    %11 = vector.shape_cast %10 : vector<4x16x4xf32> to vector<64x4xf32>
    %12 = vector.extract_strided_slice %9 {offsets = [0, 1, 0], sizes = [4, 16, 4], strides = [1, 1, 1]} : vector<6x18x4xf32> to vector<4x16x4xf32>
    %13 = vector.shape_cast %12 : vector<4x16x4xf32> to vector<64x4xf32>
    %14 = vector.extract_strided_slice %9 {offsets = [0, 2, 0], sizes = [4, 16, 4], strides = [1, 1, 1]} : vector<6x18x4xf32> to vector<4x16x4xf32>
    %15 = vector.shape_cast %14 : vector<4x16x4xf32> to vector<64x4xf32>
    %16 = vector.extract_strided_slice %9 {offsets = [1, 0, 0], sizes = [4, 16, 4], strides = [1, 1, 1]} : vector<6x18x4xf32> to vector<4x16x4xf32>
    %17 = vector.shape_cast %16 : vector<4x16x4xf32> to vector<64x4xf32>
    %18 = vector.extract_strided_slice %9 {offsets = [1, 1, 0], sizes = [4, 16, 4], strides = [1, 1, 1]} : vector<6x18x4xf32> to vector<4x16x4xf32>
    %19 = vector.shape_cast %18 : vector<4x16x4xf32> to vector<64x4xf32>
    %20 = vector.extract_strided_slice %9 {offsets = [1, 2, 0], sizes = [4, 16, 4], strides = [1, 1, 1]} : vector<6x18x4xf32> to vector<4x16x4xf32>
    %21 = vector.shape_cast %20 : vector<4x16x4xf32> to vector<64x4xf32>
    %22 = vector.extract_strided_slice %9 {offsets = [2, 0, 0], sizes = [4, 16, 4], strides = [1, 1, 1]} : vector<6x18x4xf32> to vector<4x16x4xf32>
    %23 = vector.shape_cast %22 : vector<4x16x4xf32> to vector<64x4xf32>
    %24 = vector.extract_strided_slice %9 {offsets = [2, 1, 0], sizes = [4, 16, 4], strides = [1, 1, 1]} : vector<6x18x4xf32> to vector<4x16x4xf32>
    %25 = vector.shape_cast %24 : vector<4x16x4xf32> to vector<64x4xf32>
    %26 = vector.extract_strided_slice %9 {offsets = [2, 2, 0], sizes = [4, 16, 4], strides = [1, 1, 1]} : vector<6x18x4xf32> to vector<4x16x4xf32>
    %27 = vector.shape_cast %26 : vector<4x16x4xf32> to vector<64x4xf32>
    %28 = tpu.concatenate %11, %13, %15, %17, %19, %21, %23, %25, %27 in 1 : vector<64x4xf32>, vector<64x4xf32>, vector<64x4xf32>, vector<64x4xf32>, vector<64x4xf32>, vector<64x4xf32>, vector<64x4xf32>, vector<64x4xf32>, vector<64x4xf32> -> vector<64x36xf32>
    %c0_3 = arith.constant 0 : index
    %c0_4 = arith.constant 0 : index
    %29 = vector.load %arg4[%c0_3, %c0_4] : memref<36x128xf32, #tpu.memory_space<vmem>>, vector<36x128xf32>
    %cst = arith.constant dense<0.000000e+00> : vector<64x128xf32>
    %30 = tpu.matmul %28, %29, %cst {dimension_numbers = #tpu.dot_dimension_numbers<[1], [0], [0], [1], [0, 0, 1, 1], [], []>} : vector<64x36xf32>, vector<36x128xf32>, vector<64x128xf32> -> vector<64x128xf32>
    %c0_5 = arith.constant 0 : index
    %c0_6 = arith.constant 0 : index
    %31 = vector.load %arg5[%c0_5, %c0_6] : memref<1x128xf32, #tpu.memory_space<vmem>>, vector<1x128xf32>
    %32 = vector.broadcast %31 : vector<1x128xf32> to vector<64x128xf32>
    %33 = arith.addf %30, %32 : vector<64x128xf32>
    %34 = arith.negf %33 : vector<64x128xf32>
    %35 = math.exp %34 : vector<64x128xf32>
    %cst_7 = arith.constant 1.000000e+00 : f32
    %36 = vector.broadcast %cst_7 : f32 to vector<64x128xf32>
    %37 = arith.addf %36, %35 : vector<64x128xf32>
    %38 = arith.divf %36, %37 : vector<64x128xf32>
    %39 = arith.mulf %33, %38 : vector<64x128xf32>
    %c0_8 = arith.constant 0 : index
    %c0_9 = arith.constant 0 : index
    %c0_10 = arith.constant 0 : index
    %c0_11 = arith.constant 0 : index
    %40 = vector.load %arg6[%c0_8, %c0_9, %c0_10, %c0_11] : memref<1x1x1x128xf32, #tpu.memory_space<vmem>>, vector<1x1x1x128xf32>
    %41 = vector.shape_cast %40 : vector<1x1x1x128xf32> to vector<1x128xf32>
    %cst_12 = arith.constant dense<0.000000e+00> : vector<128xf32>
    %42 = vector.multi_reduction <add>, %39, %cst_12 [0] : vector<64x128xf32> to vector<128xf32>
    %43 = vector.shape_cast %42 : vector<128xf32> to vector<1x128xf32>
    %44 = arith.addf %41, %43 : vector<1x128xf32>
    %c0_13 = arith.constant 0 : index
    %c0_14 = arith.constant 0 : index
    %c0_15 = arith.constant 0 : index
    %c0_16 = arith.constant 0 : index
    %45 = vector.load %arg6[%c0_13, %c0_14, %c0_15, %c0_16] : memref<1x1x1x128xf32, #tpu.memory_space<vmem>>, vector<1x1x1x128xf32>
    %46 = vector.shape_cast %45 : vector<1x1x1x128xf32> to vector<1x128xf32>
    %47 = vector.shape_cast %44 : vector<1x128xf32> to vector<1x1x1x128xf32>
    tpu.vector_store %arg6[%c0_13, %c0_14, %c0_15, %c0_16], %47 {strides = array<i32>} : memref<1x1x1x128xf32, #tpu.memory_space<vmem>>, vector<1x1x1x128xf32>,
    return
  }
  func.func @transform_0(%arg0: i32, %arg1: i32, %arg2: i32) -> (i32, i32, i32, i32) {
    %c0_i32 = arith.constant 0 : i32
    %c0_i32_0 = arith.constant 0 : i32
    %c0_i32_1 = arith.constant 0 : i32
    %c0_i32_2 = arith.constant 0 : i32
    return %arg0, %c0_i32, %c0_i32_0, %c0_i32_1 : i32, i32, i32, i32
  }
  func.func @transform_1(%arg0: i32, %arg1: i32, %arg2: i32) -> (i32, i32) {
    %c0_i32 = arith.constant 0 : i32
    %c0_i32_0 = arith.constant 0 : i32
    %c0_i32_1 = arith.constant 0 : i32
    return %c0_i32, %c0_i32_0 : i32, i32
  }
  func.func @transform_2(%arg0: i32, %arg1: i32, %arg2: i32) -> (i32, i32) {
    %c0_i32 = arith.constant 0 : i32
    %c0_i32_0 = arith.constant 0 : i32
    %c0_i32_1 = arith.constant 0 : i32
    return %c0_i32, %c0_i32_0 : i32, i32
  }
  func.func @transform_3(%arg0: i32, %arg1: i32, %arg2: i32) -> (i32, i32, i32, i32) {
    %c0_i32 = arith.constant 0 : i32
    %c0_i32_0 = arith.constant 0 : i32
    %c0_i32_1 = arith.constant 0 : i32
    return %arg0, %arg1, %c0_i32, %c0_i32_0 : i32, i32, i32, i32
  }
}

</mosaic_0001>

<bundles_post_ra>
// kernel: tpu_custom_call.1
= control target key start
LH: loop header
LB: loop body
LE: loop exit
PB: predicated region body
PF: predicated region fallthrough
CT: control target
= control target key end

     0   :  { %8 = vsyncpa [#allocation3], 0  ;;  %s1715_s0 = inlined_call_operand.vmem [shape: f32[2,18,18,4], index: 0, kind: input, shape index: {}]   ;;  %s1716_s1 = inlined_call_operand.vmem [shape: f32[36,128], index: 1, kind: input, shape index: {}]   ;;  %s1717_s2 = inlined_call_operand.vmem [shape: f32[1,128], index: 2, kind: input, shape index: {}]   ;;  %s1718_s3 = inlined_call_operand.hbm [shape: f32[2,2,1,128], index: 3, kind: output, shape index: {}]  }
   0x1   :  { %10 = vsyncpa [#allocation3 + $0x1], 0  ;;  %s1224_s12 = smov 0   ;;  %s1226_s13 = smov 0  }
   0x2   :  { %s1228_s14 = smov 0   ;;  %s1230_s15 = smov 0  }
   0x3   :  { %s1232_s16 = smov 0   ;;  %s1234_s17 = smov 0  }
   0x4   :  { %s1236_s18 = smov 0   ;;  %s1238_s19 = smov 0  }
   0x5   :  { %s1240_s20 = smov 0   ;;  %s1242_s21 = smov 0  }
   0x6 LB: > { %s872_s22 = sadd.s32 4294967295, %s1192_s21   ;;  %s873_s23 = sadd.s32 4294967294, %s1192_s21   ;;  %s1192_s21 = sphi %s1242_s21, %s16_s21   ;;  %s1188_s20 = sphi %s1240_s20, %s1734_s20   ;;  %s1184_s19 = sphi %s1238_s19, %s1733_s19   ;;  %s1180_s18 = sphi %s1236_s18, %s1732_s18   ;;  %s1176_s17 = sphi %s1234_s17, %s1731_s17   ;;  %s1172_s16 = sphi %s1232_s16, %s1730_s16   ;;  %s1168_s15 = sphi %s1230_s15, %s1729_s15   ;;  %s1164_s14 = sphi %s1228_s14, %s1728_s14   ;;  %s1160_s13 = sphi %s1226_s13, %s1727_s13   ;;  %s1156_s12 = sphi %s1224_s12, %s1726_s12  }
   0x7   : > { %s28_s24 = sadd.s32 1, %s1180_s18  ;;  %s31_s25 = sadd.s32 1, %s1184_s19 }
   0x8   : > { %p29_p0 = scmp.ge.s32.totalorder %s28_s24, 2  ;;  %s35_s26 = sadd.s32 1, %s1188_s20 }
   0x9   : > { %p122_p1 = scmp.ne.s32.totalorder %s1164_s14, %s1160_s13  ;;  %p123_p2 = scmp.eq.s32.totalorder %s872_s22, 7 }
   0xa   : > { %s1736_s24 = smov (%p29_p0, %s28_s24), 0  ;;  %s1738_s25 = smov (!%p29_p0, %s31_s25), %s1184_s19 }
   0xb   : > { %p128_p3 = scmp.ne.s32.totalorder %s1160_s13, %s1156_s12  ;;  %p33_p4 = scmp.ge.s32.totalorder %s1738_s25, 2 }
   0xc   : > { %p129_p5 = scmp.eq.s32.totalorder %s873_s23, 7  ;;  %p1286_p6 = por %p123_p2, %p122_p1 }
   0xd   : > { %s1740_s25 = smov (%p33_p4, %s1738_s25), 0  ;;  %s1742_s26 = smov (!%p33_p4, %s35_s26), %s1188_s20 }
   0xe   : > { %p1293_p7 = por %p129_p5, %p128_p3  ;;  %p876_p8 = scmp.ge.s32.totalorder %s1192_s21, 1 }
   0xf   : > { %p37_p9 = scmp.ge.s32.totalorder %s1742_s26, 2  ;;  %p161_p10 = scmp.lt.s32.totalorder %s1192_s21, 9 }
  0x10   : > { %s108_s29 = ssub.s32 %s1184_s19, %s1740_s25  ;;  %s112_s5 = sadd.s32 1, %s1164_s14 }
  0x11   : > { %s1744_s26 = smov (%p37_p9, %s1742_s26), 0  ;;  %p162_p11 = pnand %p876_p8, %p161_p10 }
  0x12   : > { %s107_s30 = ssub.s32 %s1188_s20, %s1744_s26  ;;  %s1719_s7 = sand.u32 (!%p162_p11), 1, %s1160_s13  }
  0x13   : > { %s109_s4 = sor.u32 %s108_s29, %s107_s30  ;;  %165 = sbr.rel (%p162_p11) target bundleno = 558 (0x22e), region = 32 }
  0x14   : > { %p110_p12 = scmp.eq.s32.totalorder %s109_s4, 0  ;;  %p184_p13 = scmp.lt.s32.totalorder (!%p162_p11), %s1176_s17, 1 }
  0x15   : > { %s1317_s23 = scalar_lea.vmem (!%p162_p11), [#allocation2], %s1719_s7  ;;  %p878_p0 = scmp.ne.s32.totalorder (!%p162_p11), %s1168_s15, 0 }
  0x16   : > { %s1307_s6 = scalar_select %p110_p12, %s1164_s14, %s112_s5  }
  0x1a   : > { %s185_s8 = scalar_select %p184_p13, %s1176_s17, 1 }
  0x1b   : > { %192 = sbr.rel (%p878_p0) target bundleno = 34 (0x22), region = 36  ;;  %v1194_v0 = vmov (!%p878_p0), 0.0  }
  0x1c   : > { %s953_s9 = smul.u32 432, %s185_s8  ;;  %193 = vst [vmem:[%s1317_s23] sm:$0x1] (!%p878_p0), %v1194_v0 }
  0x1e   : > { %s188_s22 = scalar_lea.vmem %s1715_s0, %s953_s9 }
  0x22 PF: > { %s879_s29 = sshll.u32 %s1172_s16, 1  ;;  %vm250_vm0 = vcmask 1045504   ;;  %s1195_s8 = smov 12   ;;  %vm229_vm1 = vcmask 1046528   ;;  %v561_v63 = vld [vmem:[%s1716_s1] sm:$0xff]  ;;  %v562_v0 = vld [vmem:[%s1716_s1 + $0x8] sm:$0xff] }
  0x23   : > { %s195_s30 = sadd.s32 %s1168_s15, %s879_s29  ;;  %s1196_s15 = smov 8   ;;  %vm598_vm2 = vcmask 1043456   ;;  %vm489_vm3 = vcmask 31744   ;;  %vm498_vm4 = vcmask 64512   ;;  %vm507_vm5 = vcmask 97280  }
  0x24   : > { %s881_s4 = smul.u32 96, %s195_s30  ;;  %s1197_s9 = smov 4   ;;  %vm516_vm6 = vcmask 130048   ;;  %vm525_vm7 = vcmask 162816   ;;  %vm534_vm8 = vcmask 195584   ;;  %vm543_vm9 = vcmask 228352  }
  0x25   : > { %s1198_s10 = smov 16   ;;  %s1720_s11 = smov 20   ;;  %vm552_vm10 = vcmask 261120   ;;  %vm573_vm11 = vcmask 293888  }
  0x26   : > { %s1323_s5 = scalar_lea.vmem %s188_s22, %s881_s4  ;;  %s1200_s7 = smov 24  }
  0x27   : > { %v1326_v1 = vld [vmem:[%s1323_s5 + $0x20] sm:$0xff]  ;;  %v1329_v2 = vld [vmem:[%s1323_s5 + $0x18] sm:$0xff]  ;;  %v1339_v4 = vld [vmem:[%s1323_s5 + $0x8] sm:$0xff]  ;;  %s1201_s29 = smov 28   ;;  %s1724_s30 = smov 20  }
  0x28   : > { %v1332_v3 = vld [vmem:[%s1323_s5] sm:$0xff]  ;;  %347 = vrot.lane.b32.xlu1 %v1326_v1, %s1195_s8  ;;  %345 = vrot.lane.b32.xlu0 %v1329_v2, %s1195_s8  ;;  %v201_v7 = vld [vmem:[%s1323_s5 + $0x10] sm:$0x3]  ;;  %v252_v8 = vrot.slane %v1339_v4, 2  ;;  %v231_v9 = vrot.slane %v1339_v4, 1  ;;  %v235_v15 = vrot.slane %v1329_v2, 1 }
  0x29   : > { %v251_v5 = vrot.slane %v1332_v3, 2  ;;  %v230_v6 = vrot.slane %v1332_v3, 1  ;;  %v254_v10 = vrot.slane %v201_v7, 2  ;;  %v233_v11 = vrot.slane %v201_v7, 1  ;;  %v1349_v14 = vld [vmem:[%s1323_s5 + $0x28] sm:$0x3] }
  0x2a   : > { %v236_v16 = vrot.slane %v1326_v1, 1  ;;  %v256_v17 = vrot.slane %v1329_v2, 2  ;;  %v257_v18 = vrot.slane %v1326_v1, 2  ;;  %v1360_v21 = vld [vmem:[%s1323_s5 + $0x50] sm:$0xff]  ;;  %v210_v22 = vld [vmem:[%s1323_s5 + $0x58] sm:$0x3] }
  0x2b   : > { %v253_v12 = vsel %vm250_vm0, %v251_v5, %v252_v8  ;;  %v232_v13 = vsel %vm229_vm1, %v230_v6, %v231_v9  ;;  %v255_v19 = vsel %vm250_vm0, %v252_v8, %v254_v10  ;;  %v234_v20 = vsel %vm229_vm1, %v231_v9, %v233_v11  ;;  %v1365_v24 = vld [vmem:[%s1323_s5 + $0x68] sm:$0xff]  ;;  %v1373_v29 = vld [vmem:[%s1323_s5 + $0x60] sm:$0xff]  ;;  %v213_v30 = vld [vmem:[%s1323_s5 + $0x70] sm:$0x3] }
  0x2c   : > { %321 = vrot.lane.b32.xlu1 %v253_v12, %s1196_s15  ;;  %297 = vrot.lane.b32.xlu0 %v232_v13, %s1197_s9  ;;  %v238_v23 = vrot.slane %v1349_v14, 1  ;;  %v237_v25 = vsel %vm229_vm1, %v235_v15, %v236_v16  ;;  %v258_v26 = vsel %vm250_vm0, %v256_v17, %v257_v18  ;;  %v246_v27 = vrot.slane %v1360_v21, 1  ;;  %v1380_v35 = vld [vmem:[%s1323_s5 + $0x80] sm:$0xff]  ;;  %v1383_v36 = vld [vmem:[%s1323_s5 + $0x78] sm:$0xff] }
  0x2d   : > { %v248_v28 = vrot.slane %v210_v22, 1  ;;  %v267_v31 = vrot.slane %v1360_v21, 2  ;;  %v269_v32 = vrot.slane %v210_v22, 2  ;;  %v274_v33 = vrot.slane %v1373_v29, 1  ;;  %v216_v41 = vld [vmem:[%s1323_s5 + $0x88] sm:$0x3] }
  0x2e   : > { %v275_v34 = vrot.slane %v1365_v24, 1  ;;  %v239_v37 = vsel %vm229_vm1, %v236_v16, %v238_v23  ;;  %v279_v39 = vrot.slane %v1373_v29, 2  ;;  %v280_v40 = vrot.slane %v1365_v24, 2  ;;  %v1435_v60 = vld [vmem:[%s1323_s5 + $0x30] sm:$0xff]  ;;  %v1439_v62 = vld [vmem:[%s1323_s5 + $0x38] sm:$0xff]  ;;  %v1486_v22 = vld [vmem:[%s1323_s5 + $0x48] sm:$0xff] }
  0x2f   : > { %v1389_v38 = vsel %vm229_vm1, %v246_v27, %v248_v28  ;;  %v1397_v42 = vsel %vm250_vm0, %v267_v31, %v269_v32  ;;  %v277_v44 = vrot.slane %v213_v30, 1  ;;  %v282_v45 = vrot.slane %v213_v30, 2  ;;  %v563_v8 = vld [vmem:[%s1716_s1 + $0x10] sm:$0xff]  ;;  %v564_v9 = vld [vmem:[%s1716_s1 + $0x18] sm:$0xff]  ;;  %v207_v12 = vld [vmem:[%s1323_s5 + $0x40] sm:$0x3] }
  0x30   : > { %323 = vrot.lane.b32.xlu1 %v255_v19, %s1196_s15  ;;  %299 = vrot.lane.b32.xlu0 %v234_v20, %s1197_s9  ;;  %v1400_v43 = vsel %vm229_vm1, %v274_v33, %v275_v34  ;;  %v1405_v46 = vsel %vm250_vm0, %v279_v39, %v280_v40  ;;  %v288_v47 = vrot.slane %v1380_v35, 1  ;;  %v293_v48 = vrot.slane %v1380_v35, 2  ;;  %v565_v13 = vld [vmem:[%s1716_s1 + $0x20] sm:$0xf] }
  0x31   : > { %v287_v49 = vrot.slane %v1383_v36, 1  ;;  %v1411_v50 = vsel %vm229_vm1, %v275_v34, %v277_v44  ;;  %v1414_v51 = vsel %vm250_vm0, %v280_v40, %v282_v45  ;;  %v292_v52 = vrot.slane %v1383_v36, 2 }
  0x32   : > { %v290_v53 = vrot.slane %v216_v41, 1  ;;  %v295_v55 = vrot.slane %v216_v41, 2  ;;  %v259_v59 = vrot.slane %v1349_v14, 2  ;;  %v939_v5 = vpack.c.bf16 %v562_v0, %v561_v63 }
  0x33   : > { %v1418_v54 = vsel %vm229_vm1, %v287_v49, %v288_v47  ;;  %v1424_v57 = vsel %vm250_vm0, %v292_v52, %v293_v48  ;;  %v240_v6 = vrot.slane %v1435_v60, 1  ;;  %v241_v7 = vrot.slane %v1439_v62, 1 }
  0x34   : > { %301 = vrot.lane.b32.xlu1 %v237_v25, %s1197_s9  ;;  %369 = vrot.lane.b32.xlu0 %v237_v25, %s1198_s10  ;;  %v1421_v56 = vsel %vm229_vm1, %v288_v47, %v290_v53  ;;  %v1429_v58 = vsel %vm250_vm0, %v293_v48, %v295_v55  ;;  %v260_v61 = vsel %vm250_vm0, %v257_v18, %v259_v59  ;;  %v261_v14 = vrot.slane %v1435_v60, 2 }
  0x35   : > { %940 = vmatprep.subr.bf16.mxu0 %v939_v5  ;;  %947 = vmatprep.subr.bf16.mxu1 %v939_v5  ;;  %v943_v10 = vpack.c.bf16 %v564_v9, %v563_v8  ;;  %v242_v11 = vsel %vm229_vm1, %v240_v6, %v241_v7  ;;  %v262_v15 = vrot.slane %v1439_v62, 2  ;;  %v243_v16 = vrot.slane %v207_v12, 1 }
  0x36   : > { %942 = vmatpush3.bf16.msra.mxu0 %v939_v5  ;;  %950 = vmatpush3.bf16.msra.mxu1 %v939_v5  ;;  %v264_v19 = vrot.slane %v207_v12, 2  ;;  %v245_v23 = vrot.slane %v1486_v22, 1 }
  0x37   : > { %944 = vmatprep.subr.bf16.mxu0 %v943_v10  ;;  %948 = vmatprep.subr.bf16.mxu1 %v943_v10  ;;  %v263_v17 = vsel %vm250_vm0, %v261_v14, %v262_v15  ;;  %v244_v18 = vsel %vm229_vm1, %v241_v7, %v243_v16 }
  0x38   : > { %393 = vrot.lane.b32.xlu1 %v258_v26, %s1720_s11  ;;  %371 = vrot.lane.b32.xlu0 %v239_v37, %s1198_s10  ;;  %v265_v20 = vsel %vm250_vm0, %v262_v15, %v264_v19  ;;  %v247_v25 = vsel %vm229_vm1, %v245_v23, %v246_v27 }
  0x3a   : > { %946 = vmatpush3.bf16.msra.mxu0 %v943_v10  ;;  %951 = vmatpush3.bf16.msra.mxu1 %v943_v10 }
  0x3b   : > { %925 = vmatprep.subr.msk.mxu0 %vm598_vm2, %v565_v13  ;;  %949 = vmatprep.subr.msk.mxu1 %vm598_vm2, %v565_v13 }
  0x3c   : > { %325 = vrot.lane.b32.xlu1 %v258_v26, %s1196_s15  ;;  %303 = vrot.lane.b32.xlu0 %v239_v37, %s1197_s9  ;;  %v266_v26 = vrot.slane %v1486_v22, 2 }
  0x3e   : > { %926 = vmatpush3.msk.msra.mxu0 %vm598_vm2, %v565_v13  ;;  %952 = vmatpush3.msk.msra.mxu1 %vm598_vm2, %v565_v13  ;;  %v268_v28 = vsel %vm250_vm0, %v266_v26, %v267_v31 }
  0x40   : > { %417 = vrot.lane.b32.xlu1 %v1435_v60, %s1200_s7  ;;  %395 = vrot.lane.b32.xlu0 %v260_v61, %s1720_s11  ;;  %s1202_s11 = smov 32  }
  0x44   : > { %349 = vrot.lane.b32.xlu1 %v1435_v60, %s1195_s8  ;;  %327 = vrot.lane.b32.xlu0 %v260_v61, %s1196_s15 }
  0x48   : > { %441 = vrot.lane.b32.xlu1 %v242_v11, %s1201_s29  ;;  %419 = vrot.lane.b32.xlu0 %v1439_v62, %s1200_s7 }
  0x4c   : > { %373 = vrot.lane.b32.xlu1 %v242_v11, %s1198_s10  ;;  %351 = vrot.lane.b32.xlu0 %v1439_v62, %s1195_s8 }
  0x50   : > { %465 = vrot.lane.b32.xlu1 %v263_v17, %s1202_s11  ;;  %443 = vrot.lane.b32.xlu0 %v244_v18, %s1201_s29 }
  0x54   : > { %375 = vrot.lane.b32.xlu1 %v244_v18, %s1198_s10  ;;  %305 = vrot.lane.b32.xlu0 %v242_v11, %s1197_s9 }
  0x58   : > { %467 = vrot.lane.b32.xlu1 %v265_v20, %s1202_s11  ;;  %397 = vrot.lane.b32.xlu0 %v263_v17, %s1724_s30 }
  0x5c   : > { %329 = vrot.lane.b32.xlu1 %v263_v17, %s1196_s15  ;;  %307 = vrot.lane.b32.xlu0 %v244_v18, %s1197_s9 }
  0x60   : > { %421 = vrot.lane.b32.xlu1 %v1486_v22, %s1200_s7  ;;  %399 = vrot.lane.b32.xlu0 %v265_v20, %s1724_s30 }
  0x64   : > { %353 = vrot.lane.b32.xlu1 %v1486_v22, %s1195_s8  ;;  %331 = vrot.lane.b32.xlu0 %v265_v20, %s1196_s15 }
  0x68   : > { %445 = vrot.lane.b32.xlu1 %v247_v25, %s1201_s29  ;;  %423 = vrot.lane.b32.xlu0 %v1360_v21, %s1200_s7 }
  0x6c   : > { %377 = vrot.lane.b32.xlu1 %v247_v25, %s1198_s10  ;;  %355 = vrot.lane.b32.xlu0 %v1360_v21, %s1195_s8 }
  0x70   : > { %469 = vrot.lane.b32.xlu1 %v268_v28, %s1202_s11  ;;  %447 = vrot.lane.b32.xlu0 %v1389_v38, %s1201_s29 }
  0x74   : > { %379 = vrot.lane.b32.xlu1 %v1389_v38, %s1198_s10  ;;  %309 = vrot.lane.b32.xlu0 %v247_v25, %s1197_s9 }
  0x78   : > { %471 = vrot.lane.b32.xlu1 %v1397_v42, %s1202_s11  ;;  %401 = vrot.lane.b32.xlu0 %v268_v28, %s1724_s30 }
  0x7c   : > { %333 = vrot.lane.b32.xlu1 %v268_v28, %s1196_s15  ;;  %311 = vrot.lane.b32.xlu0 %v1389_v38, %s1197_s9 }
  0x80   : > { %425 = vrot.lane.b32.xlu1 %v1373_v29, %s1200_s7  ;;  %403 = vrot.lane.b32.xlu0 %v1397_v42, %s1724_s30 }
  0x84   : > { %357 = vrot.lane.b32.xlu1 %v1373_v29, %s1195_s8  ;;  %335 = vrot.lane.b32.xlu0 %v1397_v42, %s1196_s15 }
  0x88   : > { %449 = vrot.lane.b32.xlu1 %v1400_v43, %s1201_s29  ;;  %427 = vrot.lane.b32.xlu0 %v1365_v24, %s1200_s7 }
  0x8c   : > { %381 = vrot.lane.b32.xlu1 %v1400_v43, %s1198_s10  ;;  %359 = vrot.lane.b32.xlu0 %v1365_v24, %s1195_s8  ;;  %s900_s8 = sshll.u32 %s1176_s17, 1  ;;  %s1725_s17 = sand.u32 1, %s1160_s13  }
  0x8d   : > { %s790_s15 = sadd.s32 %s1172_s16, %s900_s8 }
  0x8e   : > { %s901_s9 = sshll.u32 %s790_s15, 4 }
  0x90   : > { %473 = vrot.lane.b32.xlu1 %v1405_v46, %s1202_s11  ;;  %451 = vrot.lane.b32.xlu0 %v1411_v50, %s1201_s29 }
  0x94   : > { %405 = vrot.lane.b32.xlu1 %v1405_v46, %s1724_s30  ;;  %383 = vrot.lane.b32.xlu0 %v1411_v50, %s1198_s10  ;;  %s794_s10 = sshll.u32 %s1317_s23, 4  ;;  %s1655_s10 = int_to_ptr.vmem [resolvable:$true] %s794_s10 }
  0x95   : > { %s1082_s16 = scalar_lea.vmem %s1655_s10, 16 }
  0x96   : > { %p1083_p1 = scmp.ne.s32.totalorder %s1655_s10, %s1082_s16 }
  0x98   : > { %407 = vrot.lane.b32.xlu1 %v1414_v51, %s1724_s30  ;;  %475 = vrot.lane.b32.xlu0 %v1414_v51, %s1202_s11  ;;  %p1084_p2 = pnand %p1083_p1, %p1286_p6  ;;  %s1203_s30 = smov [#allocation2]  }
  0x9a   : > { %v348_v27 = vpop.permute.xlu1 %347  ;;  %v346_v24 = vpop.permute.xlu0 %345  ;;  %p1085_p3 = pneg %p1084_p2 }
  0x9c   : > { %431 = vrot.lane.b32.xlu1 %v1380_v35, %s1200_s7  ;;  %429 = vrot.lane.b32.xlu0 %v1383_v36, %s1200_s7  ;;  %s1086_s7 = sshll.u32 %s1203_s30, 4  ;;  %s1087_s7 = int_to_ptr.vmem [resolvable:$false] %s1086_s7 }
  0x9d   : > { %s1088_s5 = scalar_lea.vmem %s1087_s7, 32  ;;  %p1089_p4 = scmp.lt.s32.totalorder %s1655_s10, %s1087_s7 }
  0x9e   : > { %v322_v29 = vpop.permute.xlu1 %321  ;;  %v298_v30 = vpop.permute.xlu0 %297  ;;  %p1090_p5 = scmp.lt.s32.totalorder %s1088_s5, %s1082_s16 }
  0x9f   : > { %v490_v43 = vsel %vm489_vm3, %v1332_v3, %v298_v30 }
  0xa0   : > { %455 = vrot.lane.b32.xlu1 %v1421_v56, %s1201_s29  ;;  %453 = vrot.lane.b32.xlu0 %v1418_v54, %s1201_s29  ;;  %v499_v46 = vsel %vm498_vm4, %v490_v43, %v322_v29  ;;  %s1653_s29 = scalar_lea.hbm %s1718_s3, %s901_s9  ;;  %p1091_p8 = por %p1090_p5, %p1089_p4 }
  0xa1   : > { %v508_v47 = vsel %vm507_vm5, %v499_v46, %v346_v24 }
  0xa2   : > { %v324_v31 = vpop.permute.xlu1 %323  ;;  %v300_v32 = vpop.permute.xlu0 %299  ;;  %p1092_p9 = pnand %p1091_p8, %p1085_p3 }
  0xa3   : > { %v491_v51 = vsel %vm489_vm3, %v1339_v4, %v300_v32 }
  0xa4   : > { %479 = vrot.lane.b32.xlu1 %v1429_v58, %s1202_s11  ;;  %477 = vrot.lane.b32.xlu0 %v1424_v57, %s1202_s11  ;;  %v500_v56 = vsel %vm498_vm4, %v491_v51, %v324_v31  ;;  %s780_s11 = scalar_lea.sflag [#allocation3], %s1725_s17 }
  0xa5   : > { %v509_v58 = vsel %vm507_vm5, %v500_v56, %v348_v27 }
  0xa6   : > { %v302_v33 = vpop.permute.xlu1 %301  ;;  %v370_v34 = vpop.permute.xlu0 %369 }
  0xa7   : > { %v517_v50 = vsel %vm516_vm6, %v508_v47, %v370_v34  ;;  %v492_v17 = vsel %vm489_vm3, %v1329_v2, %v302_v33 }
  0xaa   : > { %v394_v35 = vpop.permute.xlu1 %393  ;;  %v372_v36 = vpop.permute.xlu0 %371 }
  0xab   : > { %v526_v3 = vsel %vm525_vm7, %v517_v50, %v394_v35  ;;  %v518_v61 = vsel %vm516_vm6, %v509_v58, %v372_v36 }
  0xae   : > { %v326_v37 = vpop.permute.xlu1 %325  ;;  %v1560_v38 = vpop.permute.xlu0 %303 }
  0xaf   : > { %v501_v18 = vsel %vm498_vm4, %v492_v17, %v326_v37  ;;  %v493_v2 = vsel %vm489_vm3, %v1326_v1, %v1560_v38 }
  0xb2   : > { %v418_v39 = vpop.permute.xlu1 %417  ;;  %v396_v40 = vpop.permute.xlu0 %395 }
  0xb3   : > { %v535_v52 = vsel %vm534_vm8, %v526_v3, %v418_v39  ;;  %v527_v63 = vsel %vm525_vm7, %v518_v61, %v396_v40 }
  0xb6   : > { %v350_v41 = vpop.permute.xlu1 %349  ;;  %v328_v42 = vpop.permute.xlu0 %327 }
  0xb7   : > { %v510_v19 = vsel %vm507_vm5, %v501_v18, %v350_v41  ;;  %v502_v31 = vsel %vm498_vm4, %v493_v2, %v328_v42 }
  0xba   : > { %v442_v44 = vpop.permute.xlu1 %441  ;;  %v420_v45 = vpop.permute.xlu0 %419 }
  0xbb   : > { %v544_v53 = vsel %vm543_vm9, %v535_v52, %v442_v44  ;;  %v536_v0 = vsel %vm534_vm8, %v527_v63, %v420_v45 }
  0xbe   : > { %v374_v48 = vpop.permute.xlu1 %373  ;;  %v352_v49 = vpop.permute.xlu0 %351 }
  0xbf   : > { %v519_v25 = vsel %vm516_vm6, %v510_v19, %v374_v48  ;;  %v511_v32 = vsel %vm507_vm5, %v502_v31, %v352_v49 }
  0xc2   : > { %v466_v54 = vpop.permute.xlu1 %465  ;;  %v444_v55 = vpop.permute.xlu0 %443 }
  0xc3   : > { %v553_v57 = vsel %vm552_vm10, %v544_v53, %v466_v54  ;;  %v545_v5 = vsel %vm543_vm9, %v536_v0, %v444_v55 }
  0xc4   : > { %927 = vmatprep.mubr.msk.f32.mxu0 %vm573_vm11, %v553_v57 }
  0xc6   : > { %v376_v59 = vpop.permute.xlu1 %375  ;;  %v306_v4 = vpop.permute.xlu0 %305 }
  0xc7   : > { %v520_v35 = vsel %vm516_vm6, %v511_v32, %v376_v59  ;;  %v494_v49 = vsel %vm489_vm3, %v1435_v60, %v306_v4  ;;  %v882_v32 = vld [vmem:[%s1717_s2] ss:$0 sm:$0xff] }
  0xca   : > { %v468_v6 = vpop.permute.xlu1 %467  ;;  %v398_v7 = vpop.permute.xlu0 %397 }
  0xcb   : > { %v554_v8 = vsel %vm552_vm10, %v545_v5, %v468_v6  ;;  %v528_v26 = vsel %vm525_vm7, %v519_v25, %v398_v7 }
  0xcc   : > { %928 = vmatmul.mubr.msk.f32.vlgmr.msra.gmra.mrb[0].mxu0 %vm573_vm11, %v554_v8 }
  0xce   : > { %v330_v9 = vpop.permute.xlu1 %329  ;;  %v308_v10 = vpop.permute.xlu0 %307 }
  0xcf   : > { %v503_v50 = vsel %vm498_vm4, %v494_v49, %v330_v9  ;;  %v495_v60 = vsel %vm489_vm3, %v1439_v62, %v308_v10 }
  0xd2   : > { %v422_v11 = vpop.permute.xlu1 %421  ;;  %v400_v12 = vpop.permute.xlu0 %399 }
  0xd3   : > { %v537_v28 = vsel %vm534_vm8, %v528_v26, %v422_v11  ;;  %v529_v36 = vsel %vm525_vm7, %v520_v35, %v400_v12 }
  0xd6   : > { %v354_v13 = vpop.permute.xlu1 %353  ;;  %v332_v14 = vpop.permute.xlu0 %331 }
  0xd7   : > { %v512_v51 = vsel %vm507_vm5, %v503_v50, %v354_v13  ;;  %v504_v4 = vsel %vm498_vm4, %v495_v60, %v332_v14 }
  0xda   : > { %v446_v15 = vpop.permute.xlu1 %445  ;;  %v424_v16 = vpop.permute.xlu0 %423 }
  0xdb   : > { %v546_v27 = vsel %vm543_vm9, %v537_v28, %v446_v15  ;;  %v538_v37 = vsel %vm534_vm8, %v529_v36, %v424_v16 }
  0xde   : > { %v378_v20 = vpop.permute.xlu1 %377  ;;  %v356_v23 = vpop.permute.xlu0 %355 }
  0xdf   : > { %v521_v53 = vsel %vm516_vm6, %v512_v51, %v378_v20  ;;  %v513_v61 = vsel %vm507_vm5, %v504_v4, %v356_v23 }
  0xe2   : > { %v470_v24 = vpop.permute.xlu1 %469  ;;  %v448_v29 = vpop.permute.xlu0 %447 }
  0xe3   : > { %v555_v30 = vsel %vm552_vm10, %v546_v27, %v470_v24  ;;  %v547_v39 = vsel %vm543_vm9, %v538_v37, %v448_v29 }
  0xe4   : > { %930 = vmatprep.mubr.msk.f32.mxu0 %vm573_vm11, %v555_v30 }
  0xe6   : > { %v380_v33 = vpop.permute.xlu1 %379  ;;  %v310_v34 = vpop.permute.xlu0 %309 }
  0xe7   : > { %v522_v5 = vsel %vm516_vm6, %v513_v61, %v380_v33  ;;  %v496_v13 = vsel %vm489_vm3, %v1486_v22, %v310_v34 }
  0xea   : > { %v472_v40 = vpop.permute.xlu1 %471  ;;  %v402_v41 = vpop.permute.xlu0 %401 }
  0xeb   : > { %v556_v1 = vsel %vm552_vm10, %v547_v39, %v472_v40  ;;  %v530_v54 = vsel %vm525_vm7, %v521_v53, %v402_v41 }
  0xec   : > { %931 = vmatmul.mubr.msk.f32.gmra.mrb[2].mxu0 %vm573_vm11, %v556_v1 }
  0xee   : > { %v334_v38 = vpop.permute.xlu1 %333  ;;  %v312_v42 = vpop.permute.xlu0 %311 }
  0xef   : > { %v497_v14 = vsel %vm489_vm3, %v1360_v21, %v312_v42  ;;  %v505_v15 = vsel %vm498_vm4, %v496_v13, %v334_v38 }
  0xf2   : > { %v426_v43 = vpop.permute.xlu1 %425  ;;  %v404_v44 = vpop.permute.xlu0 %403 }
  0xf3   : > { %v539_v55 = vsel %vm534_vm8, %v530_v54, %v426_v43  ;;  %v531_v6 = vsel %vm525_vm7, %v522_v5, %v404_v44 }
  0xf6   : > { %v358_v45 = vpop.permute.xlu1 %357  ;;  %v336_v46 = vpop.permute.xlu0 %335 }
  0xf7   : > { %v506_v16 = vsel %vm498_vm4, %v497_v14, %v336_v46  ;;  %v514_v17 = vsel %vm507_vm5, %v505_v15, %v358_v45 }
  0xfa   : > { %v450_v47 = vpop.permute.xlu1 %449  ;;  %v428_v48 = vpop.permute.xlu0 %427 }
  0xfb   : > { %v548_v56 = vsel %vm543_vm9, %v539_v55, %v450_v47  ;;  %v540_v7 = vsel %vm534_vm8, %v531_v6, %v428_v48 }
  0xfe   : > { %v382_v3 = vpop.permute.xlu1 %381  ;;  %v360_v52 = vpop.permute.xlu0 %359 }
  0xff   : > { %v515_v18 = vsel %vm507_vm5, %v506_v16, %v360_v52  ;;  %v523_v23 = vsel %vm516_vm6, %v514_v17, %v382_v3 }
 0x102   : > { %v474_v57 = vpop.permute.xlu1 %473  ;;  %v452_v58 = vpop.permute.xlu0 %451 }
 0x103   : > { %v557_v59 = vsel %vm552_vm10, %v548_v56, %v474_v57  ;;  %v549_v8 = vsel %vm543_vm9, %v540_v7, %v452_v58 }
 0x104   : > { %933 = vmatprep.mubr.msk.f32.mxu1 %vm573_vm11, %v557_v59 }
 0x106   : > { %v406_v63 = vpop.permute.xlu1 %405  ;;  %v384_v0 = vpop.permute.xlu0 %383 }
 0x107   : > { %v524_v25 = vsel %vm516_vm6, %v515_v18, %v384_v0  ;;  %v532_v26 = vsel %vm525_vm7, %v523_v23, %v406_v63 }
 0x10a   : > { %v408_v9 = vpop.permute.xlu1 %407  ;;  %v476_v11 = vpop.permute.xlu0 %475 }
 0x10b   : > { %v558_v62 = vsel %vm552_vm10, %v549_v8, %v476_v11  ;;  %v533_v22 = vsel %vm525_vm7, %v524_v25, %v408_v9 }
 0x10c   : > { %934 = vmatmul.mubr.msk.f32.vlgmr.msra.gmra.mrb[0].mxu1 %vm573_vm11, %v558_v62 }
 0x10e   : > { %v432_v10 = vpop.permute.xlu1 %431  ;;  %v430_v12 = vpop.permute.xlu0 %429 }
 0x10f   : > { %v542_v21 = vsel %vm534_vm8, %v533_v22, %v432_v10  ;;  %v541_v28 = vsel %vm534_vm8, %v532_v26, %v430_v12 }
 0x112   : > { %v456_v19 = vpop.permute.xlu1 %455  ;;  %v454_v20 = vpop.permute.xlu0 %453 }
 0x113   : > { %v551_v27 = vsel %vm543_vm9, %v542_v21, %v456_v19  ;;  %v550_v24 = vsel %vm543_vm9, %v541_v28, %v454_v20 }
 0x116   : > { %v480_v29 = vpop.permute.xlu1 %479  ;;  %v478_v30 = vpop.permute.xlu0 %477 }
 0x117   : > { %v560_v2 = vsel %vm552_vm10, %v551_v27, %v480_v29  ;;  %v559_v31 = vsel %vm552_vm10, %v550_v24, %v478_v30 }
 0x118   : > { %936 = vmatprep.mubr.msk.f32.mxu1 %vm573_vm11, %v559_v31 }
 0x119   : > { %937 = vmatmul.mubr.msk.f32.gmra.mrb[2].mxu1 %vm573_vm11, %v560_v2 }
 0x19f   : > { %v929_v33 = vpop.f32.mrb[0].mxu0 }
 0x1a0   : > { %v674_v34 = vadd.f32 %v929_v33, %v882_v32  ;;  %v668_v35 = vpop.f32.mrb[1].mxu0 }
 0x1a1   : > { %v669_v36 = vadd.f32 %v882_v32, %v668_v35 }
 0x1a2   : > { %v893_v37 = vmul.f32 -1.442695, %v674_v34 }
 0x1a3   : > { %v892_v39 = vmul.f32 -1.442695, %v669_v36 }
 0x1a4   : > { %1050 = vpow2.f32 %v893_v37  ;;  %v763_v37 = vld [vmem:[%s1317_s23] sm:$0x1] }
 0x1a5   : > { %1052 = vpow2.f32 %v892_v39 }
 0x1ae   : > { %v1051_v40 = vpop.eup %1050 }
 0x1af   : > { %v1053_v41 = vpop.eup %1052  ;;  %v732_v1 = vadd.f32 1.0, %v1051_v40 }
 0x1b0   : > { %v731_v38 = vadd.f32 1.0, %v1053_v41 }
 0x1b1   : > { %1054 = vrcp.f32 %v732_v1 }
 0x1b2   : > { %1056 = vrcp.f32 %v731_v38 }
 0x1bb   : > { %v1055_v42 = vpop.eup %1054 }
 0x1bc   : > { %v1057_v43 = vpop.eup %1056  ;;  %v756_v44 = vmul.f32 %v1055_v42, %v674_v34 }
 0x1bd   : > { %v755_v45 = vmul.f32 %v1057_v43, %v669_v36 }
 0x1bf   : > { %v764_v46 = vadd.f32 %v756_v44, %v755_v45  ;;  %v932_v47 = vpop.f32.mrb[2].mxu0 }
 0x1c0   : > { %v684_v48 = vadd.f32 %v932_v47, %v882_v32  ;;  %v678_v49 = vpop.f32.mrb[3].mxu0 }
 0x1c1   : > { %v679_v50 = vadd.f32 %v882_v32, %v678_v49 }
 0x1c2   : > { %v895_v51 = vmul.f32 -1.442695, %v684_v48 }
 0x1c3   : > { %v894_v3 = vmul.f32 -1.442695, %v679_v50 }
 0x1c4   : > { %1058 = vpow2.f32 %v895_v51 }
 0x1c5   : > { %1060 = vpow2.f32 %v894_v3 }
 0x1ce   : > { %v1059_v52 = vpop.eup %1058 }
 0x1cf   : > { %v1061_v53 = vpop.eup %1060  ;;  %v734_v54 = vadd.f32 1.0, %v1059_v52 }
 0x1d0   : > { %v733_v55 = vadd.f32 1.0, %v1061_v53 }
 0x1d1   : > { %1062 = vrcp.f32 %v734_v54 }
 0x1d2   : > { %1064 = vrcp.f32 %v733_v55 }
 0x1db   : > { %v1063_v56 = vpop.eup %1062 }
 0x1dc   : > { %v1065_v57 = vpop.eup %1064  ;;  %v758_v59 = vmul.f32 %v1063_v56, %v684_v48 }
 0x1dd   : > { %v757_v58 = vmul.f32 %v1065_v57, %v679_v50 }
 0x1df   : > { %v765_v60 = vadd.f32 %v764_v46, %v757_v58  ;;  %v935_v4 = vpop.f32.mrb[0].mxu1 }
 0x1e0   : > { %v694_v61 = vadd.f32 %v935_v4, %v882_v32  ;;  %v688_v63 = vpop.f32.mrb[1].mxu1 }
 0x1e1   : > { %v689_v0 = vadd.f32 %v882_v32, %v688_v63  ;;  %v766_v5 = vadd.f32 %v765_v60, %v758_v59 }
 0x1e2   : > { %v897_v6 = vmul.f32 -1.442695, %v694_v61 }
 0x1e3   : > { %v896_v7 = vmul.f32 -1.442695, %v689_v0 }
 0x1e4   : > { %1066 = vpow2.f32 %v897_v6 }
 0x1e5   : > { %1068 = vpow2.f32 %v896_v7 }
 0x1ec   : > { %v938_v8 = vpop.f32.mrb[2].mxu1 }
 0x1ed   : > { %v704_v9 = vadd.f32 %v938_v8, %v882_v32  ;;  %v698_v11 = vpop.f32.mrb[3].mxu1 }
 0x1ee   : > { %v1067_v62 = vpop.eup %1066  ;;  %v699_v10 = vadd.f32 %v882_v32, %v698_v11 }
 0x1ef   : > { %v1069_v12 = vpop.eup %1068  ;;  %v736_v13 = vadd.f32 1.0, %v1067_v62  ;;  %v899_v14 = vmul.f32 -1.442695, %v704_v9 }
 0x1f0   : > { %v735_v15 = vadd.f32 1.0, %v1069_v12  ;;  %v898_v16 = vmul.f32 -1.442695, %v699_v10 }
 0x1f1   : > { %1070 = vrcp.f32 %v736_v13 }
 0x1f2   : > { %1072 = vrcp.f32 %v735_v15 }
 0x1f3   : > { %1074 = vpow2.f32 %v899_v14 }
 0x1f4   : > { %1076 = vpow2.f32 %v898_v16 }
 0x1fb   : > { %v1071_v17 = vpop.eup %1070 }
 0x1fc   : > { %v1073_v18 = vpop.eup %1072  ;;  %v760_v26 = vmul.f32 %v1071_v17, %v694_v61 }
 0x1fd   : > { %v1075_v19 = vpop.eup %1074  ;;  %v759_v20 = vmul.f32 %v1073_v18, %v689_v0 }
 0x1fe   : > { %v1077_v23 = vpop.eup %1076  ;;  %v738_v25 = vadd.f32 1.0, %v1075_v19 }
 0x1ff   : > { %v767_v22 = vadd.f32 %v766_v5, %v759_v20  ;;  %v737_v21 = vadd.f32 1.0, %v1077_v23 }
 0x200   : > { %1078 = vrcp.f32 %v738_v25 }
 0x201   : > { %1080 = vrcp.f32 %v737_v21  ;;  %v768_v28 = vadd.f32 %v767_v22, %v760_v26 }
 0x20a   : > { %v1079_v27 = vpop.eup %1078 }
 0x20b   : > { %v1081_v24 = vpop.eup %1080  ;;  %v762_v30 = vmul.f32 %v1079_v27, %v704_v9 }
 0x20c   : > { %v761_v29 = vmul.f32 %v1081_v24, %v699_v10 }
 0x20e   : > { %v769_v2 = vadd.f32 %v768_v28, %v761_v29 }
 0x210   : > { %v770_v31 = vadd.f32 %v769_v2, %v762_v30 }
 0x212   : > { %v771_v32 = vrot.slane %v770_v31, 4 }
 0x214   : > { %v772_v33 = vadd.f32 %v771_v32, %v770_v31 }
 0x216   : > { %v773_v34 = vrot.slane %v772_v33, 2 }
 0x218   : > { %v774_v35 = vadd.f32 %v773_v34, %v772_v33 }
 0x21a   : > { %v775_v36 = vrot.slane %v774_v35, 1 }
 0x21c   : > { %v776_v39 = vadd.f32 %v775_v36, %v774_v35 }
 0x21e   : > { %v777_v40 = vadd.f32 %v776_v39, %v763_v37 }
 0x220   : > { %778 = vst [vmem:[%s1317_s23] sm:$0x1] %v777_v40 }
 0x221   : > { %1095 = shalt.err (!%p1092_p9)
}
 0x222   : > { %s1096_s23 = scalar_lea.hbm %s1653_s29, 16  ;;  %s1100_s9 = scalar_lea.hbm %s1718_s3, 64 }
 0x223   : > { %p1097_p10 = scmp.ne.s32.totalorder %s1653_s29, %s1096_s23  ;;  %p1101_p13 = scmp.lt.u32.totalorder %s1653_s29, %s1718_s3 }
 0x224   : > { %p1102_p0 = scmp.lt.u32.totalorder %s1100_s9, %s1096_s23  ;;  %p1104_p2 = scmp.lt.u32.totalorder %s1096_s23, %s1653_s29 }
 0x225   : > { %p1098_p11 = pnand %p1097_p10, %p1286_p6 }
 0x226   : > { %p1103_p1 = por %p1102_p0, %p1101_p13 }
 0x227   : > { %p1099_p12 = pneg %p1098_p11 }
 0x228   : > { %p1105_p3 = por %p1104_p2, %p1103_p1 }
 0x22a   : > { %p1106_p4 = pnand %p1105_p3, %p1099_p12 }
 0x22c   : > { %1109 = shalt.err (!%p1106_p4)
}
 0x22d   : > { %954 = dma.vmem_to_hbm [thread:$0]  (%p1286_p6), %s1655_s10, 16, %s1653_s29, %s780_s11  }
 0x22e PF: > { %p960_p5 = scmp.ge.s32.totalorder %s1192_s21, 2  ;;  %s806_s17 = sand.u32 1, %s1156_s12  }
 0x22f   : > { %s807_s16 = scalar_lea.sflag [#allocation3], %s806_s17 }
 0x230   : > { %p957_p8 = pnand %p960_p5, %p1293_p7 }
 0x232   : > { %1151 = dma.done.wait (!%p957_p8), %s807_s16, 16  }
 0x233   : > { %1153 = vsyncadd (!%p957_p8), %s807_s16, 4294967280  ;;  %s16_s21 = sadd.s32 1, %s1192_s21   ;;  %s1726_s12 = smov %s1160_s13 }
 0x234   : > { %p13_p9 = scmp.ge.s32.totalorder %s16_s21, 10   ;;  %s1727_s13 = smov %s1164_s14 }
 0x235   : > { %s1728_s14 = smov %s1307_s6  ;;  %s1729_s15 = smov %s1180_s18 }
 0x236   : > { %s1730_s16 = smov %s1184_s19  ;;  %s1731_s17 = smov %s1188_s20 }
 0x237   : > { %s1732_s18 = smov %s1736_s24  ;;  %s1733_s19 = smov %s1740_s25 }
 0x238   : > { %s1734_s20 = smov %s1744_s26  ;;  %15 = sbr.rel (!%p13_p9) target bundleno = 6 (0x6), region = 72 }
 0x23f   :  { %811 = vsyncpa [#allocation3], 1 }
 0x240   :  { %813 = vsyncpa [#allocation3 + $0x1], 1 }

</bundles_post_ra>
